<compile_context>
chip_gen: v6e
topology: v6e:2x2x1
jax: 0.10.0
libtpu: 0.0.40
codegen_flags: <defaults>
</compile_context>

<pallas_src>
import jax
import jax.numpy as jnp
from jax.experimental import pallas as pl
from jax.experimental.pallas import tpu as pltpu

HIDDEN = 128
LANE = 128
NEG_BIG = -1e30  # finite "-inf": exp() underflows to 0, no inf-inf NaN risk


def _round_up(x, m):
    return ((x + m - 1) // m) * m


def actor_kernel(x_ref, w1_ref, b1_ref, w2_ref, b2_ref, w3_ref, b3_ref, out_ref):
    # Activations / elementwise in f32; MXU operands in bf16; f32 accumulation.
    x = x_ref[...]

    # fc1 + relu
    h1 = jnp.dot(x.astype(jnp.bfloat16), w1_ref[...],
                 preferred_element_type=jnp.float32) + b1_ref[...]
    h1 = jnp.maximum(h1, 0.0)

    # fc2 + relu
    h2 = jnp.dot(h1.astype(jnp.bfloat16), w2_ref[...],
                 preferred_element_type=jnp.float32) + b2_ref[...]
    h2 = jnp.maximum(h2, 0.0)

    # fc3: output feature dim padded to a multiple of 128 lanes; padded lanes
    # carry a -1e30 bias so they vanish in the softmax (no in-kernel masking).
    logits = jnp.dot(h2.astype(jnp.bfloat16), w3_ref[...],
                     preferred_element_type=jnp.float32) + b3_ref[...]

    # Numerically stable softmax along the lane axis.
    m = jnp.max(logits, axis=-1, keepdims=True)
    e = jnp.exp(logits - m)
    denom = jnp.sum(e, axis=-1, keepdims=True)
    # approx=True -> EUP vrcp (separate VLIW slot), ~1e-3 rel error.
    out_ref[...] = (e * pl.reciprocal(denom, approx=True)).astype(out_ref.dtype)


def actor_forward(x, params, *, block_b=512):
    """x: [B, input_dim] float32. params: (in, out) weights, (1, out) biases."""
    w1, b1 = params["w1"], params["b1"]
    w2, b2 = params["w2"], params["b2"]
    w3, b3 = params["w3"], params["b3"]

    B, in_dim = x.shape
    out_dim = w3.shape[1]
    n_pad = _round_up(out_dim, LANE)

    # Zero-pad fc3 weights so the kernel output is lane-dense; fold the padded
    # lane mask into the bias (padded entries = -1e30 -> softmax prob 0).
    w3p = jnp.zeros((HIDDEN, n_pad), w3.dtype).at[:, :out_dim].set(w3)
    b3p = jnp.full((1, n_pad), NEG_BIG, b3.dtype).at[:, :out_dim].set(b3)

    # bf16 MXU operands (halves weight DMA bytes + resident VMEM footprint).
    w1b = w1.astype(jnp.bfloat16)
    w2b = w2.astype(jnp.bfloat16)
    w3b = w3p.astype(jnp.bfloat16)

    # Batch tile: as large as practical. If B < block_b the block equals the
    # full batch dim (always legal); otherwise block_b is a multiple of 8.
    tb = B if B < block_b else block_b
    grid = (pl.cdiv(B, tb),)

    # Weights/biases stay resident across batch tiles.
    resident = lambda shape: pl.BlockSpec(shape, lambda i: (0, 0))

    flops = 2 * B * (in_dim * HIDDEN + HIDDEN * HIDDEN + HIDDEN * n_pad)
    bytes_accessed = (
        x.size * 4 + B * n_pad * 4                      # activations in/out (f32)
        + (w1b.size + w2b.size + w3b.size) * 2          # bf16 weights
        + (b1.size + b2.size + b3p.size) * 4            # f32 biases
    )
    cost = pl.CostEstimate(flops=flops,
                           transcendentals=B * n_pad,    # exp per logit
                           bytes_accessed=bytes_accessed)

    out_padded = pl.pallas_call(
        actor_kernel,
        out_shape=jax.ShapeDtypeStruct((B, n_pad), jnp.float32),
        grid_spec=pltpu.PrefetchScalarGridSpec(
            num_scalar_prefetch=0,
            grid=grid,
            in_specs=[
                pl.BlockSpec((tb, in_dim), lambda i: (i, 0)),
                resident(w1b.shape), resident(b1.shape),
                resident(w2b.shape), resident(b2.shape),
                resident(w3b.shape), resident(b3p.shape),
            ],
            out_specs=pl.BlockSpec((tb, n_pad), lambda i: (i, 0)),
        ),
        compiler_params=pltpu.CompilerParams(
            dimension_semantics=("parallel",)),
        cost_estimate=cost,
    )(x, w1b, b1, w2b, b2, w3b, b3p)

    return out_padded[:, :out_dim]


def init_params(key, input_dim, output_dim, hidden=HIDDEN):
    """Deterministic init mimicking nn.Linear's U(-1/sqrt(fan_in), 1/sqrt(fan_in))."""
    ks = jax.random.split(key, 6)

    def linear(kw, kb, fan_in, fan_out):
        bound = 1.0 / jnp.sqrt(jnp.float32(fan_in))
        # Stored as [in, out] so the kernel does x @ W (PyTorch stores [out, in]).
        w = jax.random.uniform(kw, (fan_in, fan_out), jnp.float32, -bound, bound)
        b = jax.random.uniform(kb, (1, fan_out), jnp.float32, -bound, bound)
        return w, b

    w1, b1 = linear(ks[0], ks[1], input_dim, hidden)
    w2, b2 = linear(ks[2], ks[3], hidden, hidden)
    w3, b3 = linear(ks[4], ks[5], hidden, output_dim)
    return {"w1": w1, "b1": b1, "w2": w2, "b2": b2, "w3": w3, "b3": b3}


def actor_reference(x, params):
    """Pure-JAX reference with the same bf16-operand / f32-accumulate recipe."""
    w1b = params["w1"].astype(jnp.bfloat16)
    w2b = params["w2"].astype(jnp.bfloat16)
    w3b = params["w3"].astype(jnp.bfloat16)
    h1 = jax.nn.relu(jnp.dot(x.astype(jnp.bfloat16), w1b,
                             preferred_element_type=jnp.float32) + params["b1"])
    h2 = jax.nn.relu(jnp.dot(h1.astype(jnp.bfloat16), w2b,
                             preferred_element_type=jnp.float32) + params["b2"])
    logits = jnp.dot(h2.astype(jnp.bfloat16), w3b,
                     preferred_element_type=jnp.float32) + params["b3"]
    return jax.nn.softmax(logits, axis=-1)


if __name__ == "__main__":
    key = jax.random.PRNGKey(0)
    k_param, k_x = jax.random.split(key)

    batch, input_dim, output_dim = 8, 32, 8
    params = init_params(k_param, input_dim, output_dim)
    x = jax.random.normal(k_x, (batch, input_dim), jnp.float32)

    out = actor_forward(x, params)
    jax.block_until_ready(out)

    ref = actor_reference(x, params)
    assert out.shape == (batch, output_dim)
    # approx reciprocal (~1e-3 rel) + bf16 matmuls -> relaxed tolerances.
    assert jnp.allclose(jnp.sum(out, axis=-1), 1.0, atol=2e-3)
    assert jnp.allclose(out, ref, atol=1e-2, rtol=1e-2)

    print("KERNEL_OK")
</pallas_src>

<mosaic_0001>
module attributes {stable_mosaic.version = 11 : i64} {
  func.func @actor_kernel(%arg0: i32, %arg1: memref<8x32xf32, #tpu.memory_space<vmem>>, %arg2: memref<32x128xbf16, #tpu.memory_space<vmem>>, %arg3: memref<1x128xf32, #tpu.memory_space<vmem>>, %arg4: memref<128x128xbf16, #tpu.memory_space<vmem>>, %arg5: memref<1x128xf32, #tpu.memory_space<vmem>>, %arg6: memref<128x128xbf16, #tpu.memory_space<vmem>>, %arg7: memref<1x128xf32, #tpu.memory_space<vmem>>, %arg8: memref<8x128xf32, #tpu.memory_space<vmem>>) attributes {dimension_semantics = [#tpu.dimension_semantics<parallel>], iteration_bounds = array<i64: 1>, scalar_prefetch = 0 : i64, scratch_operands = 0 : i64, tpu.core_type = #tpu.core_type<tc>, window_params = [{transform_indices = @transform_0, window_bounds = array<i64: 8, 32>}, {pipeline_mode = #tpu.pipeline_mode<synchronous>, transform_indices = @transform_1, window_bounds = array<i64: 32, 128>}, {pipeline_mode = #tpu.pipeline_mode<synchronous>, transform_indices = @transform_2, window_bounds = array<i64: 1, 128>}, {pipeline_mode = #tpu.pipeline_mode<synchronous>, transform_indices = @transform_3, window_bounds = array<i64: 128, 128>}, {pipeline_mode = #tpu.pipeline_mode<synchronous>, transform_indices = @transform_4, window_bounds = array<i64: 1, 128>}, {pipeline_mode = #tpu.pipeline_mode<synchronous>, transform_indices = @transform_5, window_bounds = array<i64: 128, 128>}, {pipeline_mode = #tpu.pipeline_mode<synchronous>, transform_indices = @transform_6, window_bounds = array<i64: 1, 128>}, {transform_indices = @transform_7, window_bounds = array<i64: 8, 128>}]} {
    %c0 = arith.constant 0 : index
    %c0_0 = arith.constant 0 : index
    %0 = vector.load %arg1[%c0, %c0_0] : memref<8x32xf32, #tpu.memory_space<vmem>>, vector<8x32xf32>
    %1 = arith.truncf %0 : vector<8x32xf32> to vector<8x32xbf16>
    %c0_1 = arith.constant 0 : index
    %c0_2 = arith.constant 0 : index
    %2 = vector.load %arg2[%c0_1, %c0_2] : memref<32x128xbf16, #tpu.memory_space<vmem>>, vector<32x128xbf16>
    %cst = arith.constant dense<0.000000e+00> : vector<8x128xf32>
    %3 = tpu.matmul %1, %2, %cst {dimension_numbers = #tpu.dot_dimension_numbers<[1], [0], [0], [1], [0, 0, 1, 1], [], []>} : vector<8x32xbf16>, vector<32x128xbf16>, vector<8x128xf32> -> vector<8x128xf32>
    %c0_3 = arith.constant 0 : index
    %c0_4 = arith.constant 0 : index
    %4 = vector.load %arg3[%c0_3, %c0_4] : memref<1x128xf32, #tpu.memory_space<vmem>>, vector<1x128xf32>
    %5 = vector.broadcast %4 : vector<1x128xf32> to vector<8x128xf32>
    %6 = arith.addf %3, %5 : vector<8x128xf32>
    %cst_5 = arith.constant 0.000000e+00 : f32
    %7 = vector.broadcast %cst_5 : f32 to vector<8x128xf32>
    %8 = arith.maximumf %6, %7 : vector<8x128xf32>
    %9 = arith.truncf %8 : vector<8x128xf32> to vector<8x128xbf16>
    %c0_6 = arith.constant 0 : index
    %c0_7 = arith.constant 0 : index
    %10 = vector.load %arg4[%c0_6, %c0_7] : memref<128x128xbf16, #tpu.memory_space<vmem>>, vector<128x128xbf16>
    %cst_8 = arith.constant dense<0.000000e+00> : vector<8x128xf32>
    %11 = tpu.matmul %9, %10, %cst_8 {dimension_numbers = #tpu.dot_dimension_numbers<[1], [0], [0], [1], [0, 0, 1, 1], [], []>} : vector<8x128xbf16>, vector<128x128xbf16>, vector<8x128xf32> -> vector<8x128xf32>
    %c0_9 = arith.constant 0 : index
    %c0_10 = arith.constant 0 : index
    %12 = vector.load %arg5[%c0_9, %c0_10] : memref<1x128xf32, #tpu.memory_space<vmem>>, vector<1x128xf32>
    %13 = vector.broadcast %12 : vector<1x128xf32> to vector<8x128xf32>
    %14 = arith.addf %11, %13 : vector<8x128xf32>
    %cst_11 = arith.constant 0.000000e+00 : f32
    %15 = vector.broadcast %cst_11 : f32 to vector<8x128xf32>
    %16 = arith.maximumf %14, %15 : vector<8x128xf32>
    %17 = arith.truncf %16 : vector<8x128xf32> to vector<8x128xbf16>
    %c0_12 = arith.constant 0 : index
    %c0_13 = arith.constant 0 : index
    %18 = vector.load %arg6[%c0_12, %c0_13] : memref<128x128xbf16, #tpu.memory_space<vmem>>, vector<128x128xbf16>
    %cst_14 = arith.constant dense<0.000000e+00> : vector<8x128xf32>
    %19 = tpu.matmul %17, %18, %cst_14 {dimension_numbers = #tpu.dot_dimension_numbers<[1], [0], [0], [1], [0, 0, 1, 1], [], []>} : vector<8x128xbf16>, vector<128x128xbf16>, vector<8x128xf32> -> vector<8x128xf32>
    %c0_15 = arith.constant 0 : index
    %c0_16 = arith.constant 0 : index
    %20 = vector.load %arg7[%c0_15, %c0_16] : memref<1x128xf32, #tpu.memory_space<vmem>>, vector<1x128xf32>
    %21 = vector.broadcast %20 : vector<1x128xf32> to vector<8x128xf32>
    %22 = arith.addf %19, %21 : vector<8x128xf32>
    %cst_17 = arith.constant dense<0xFF800000> : vector<8xf32>
    %23 = vector.multi_reduction <maximumf>, %22, %cst_17 [1] : vector<8x128xf32> to vector<8xf32>
    %24 = vector.shape_cast %23 : vector<8xf32> to vector<8x1xf32>
    %25 = vector.broadcast %24 : vector<8x1xf32> to vector<8x128xf32>
    %26 = arith.subf %22, %25 : vector<8x128xf32>
    %27 = math.exp %26 : vector<8x128xf32>
    %cst_18 = arith.constant dense<0.000000e+00> : vector<8xf32>
    %28 = vector.multi_reduction <add>, %27, %cst_18 [1] : vector<8x128xf32> to vector<8xf32>
    %29 = vector.shape_cast %28 : vector<8xf32> to vector<8x1xf32>
    %30 = tpu.reciprocal %29 {approx = true} : vector<8x1xf32> -> vector<8x1xf32>
    %31 = vector.broadcast %30 : vector<8x1xf32> to vector<8x128xf32>
    %32 = arith.mulf %27, %31 : vector<8x128xf32>
    %c0_19 = arith.constant 0 : index
    %c0_20 = arith.constant 0 : index
    %33 = vector.load %arg8[%c0_19, %c0_20] : memref<8x128xf32, #tpu.memory_space<vmem>>, vector<8x128xf32>
    tpu.vector_store %arg8[%c0_19, %c0_20], %32 {strides = array<i32>} : memref<8x128xf32, #tpu.memory_space<vmem>>, vector<8x128xf32>,
    return
  }
  func.func @transform_0(%arg0: i32) -> (i32, i32) {
    %c0_i32 = arith.constant 0 : i32
    %c0_i32_0 = arith.constant 0 : i32
    return %arg0, %c0_i32 : i32, i32
  }
  func.func @transform_1(%arg0: i32) -> (i32, i32) {
    %c0_i32 = arith.constant 0 : i32
    %c0_i32_0 = arith.constant 0 : i32
    %c0_i32_1 = arith.constant 0 : i32
    return %c0_i32, %c0_i32_0 : i32, i32
  }
  func.func @transform_2(%arg0: i32) -> (i32, i32) {
    %c0_i32 = arith.constant 0 : i32
    %c0_i32_0 = arith.constant 0 : i32
    %c0_i32_1 = arith.constant 0 : i32
    return %c0_i32, %c0_i32_0 : i32, i32
  }
  func.func @transform_3(%arg0: i32) -> (i32, i32) {
    %c0_i32 = arith.constant 0 : i32
    %c0_i32_0 = arith.constant 0 : i32
    %c0_i32_1 = arith.constant 0 : i32
    return %c0_i32, %c0_i32_0 : i32, i32
  }
  func.func @transform_4(%arg0: i32) -> (i32, i32) {
    %c0_i32 = arith.constant 0 : i32
    %c0_i32_0 = arith.constant 0 : i32
    %c0_i32_1 = arith.constant 0 : i32
    return %c0_i32, %c0_i32_0 : i32, i32
  }
  func.func @transform_5(%arg0: i32) -> (i32, i32) {
    %c0_i32 = arith.constant 0 : i32
    %c0_i32_0 = arith.constant 0 : i32
    %c0_i32_1 = arith.constant 0 : i32
    return %c0_i32, %c0_i32_0 : i32, i32
  }
  func.func @transform_6(%arg0: i32) -> (i32, i32) {
    %c0_i32 = arith.constant 0 : i32
    %c0_i32_0 = arith.constant 0 : i32
    %c0_i32_1 = arith.constant 0 : i32
    return %c0_i32, %c0_i32_0 : i32, i32
  }
  func.func @transform_7(%arg0: i32) -> (i32, i32) {
    %c0_i32 = arith.constant 0 : i32
    %c0_i32_0 = arith.constant 0 : i32
    return %arg0, %c0_i32 : i32, i32
  }
}

</mosaic_0001>

<bundles_post_ra>
// kernel: tpu_custom_call.1
= control target key start
LH: loop header
LB: loop body
LE: loop exit
PB: predicated region body
PF: predicated region fallthrough
CT: control target
= control target key end

     0   :  { %12 = vsyncpa [#allocation3], 0  ;;  %s739_s0 = inlined_call_operand.hbm [shape: f32[8,32], index: 0, kind: input, shape index: {}]   ;;  %s740_s1 = inlined_call_operand.hbm [shape: bf16[32,128], index: 1, kind: input, shape index: {}]   ;;  %s741_s2 = inlined_call_operand.vmem [shape: f32[1,128], index: 2, kind: input, shape index: {}]   ;;  %s742_s3 = inlined_call_operand.hbm [shape: bf16[128,128], index: 3, kind: input, shape index: {}]   ;;  %s743_s4 = inlined_call_operand.vmem [shape: f32[1,128], index: 4, kind: input, shape index: {}]   ;;  %s744_s5 = inlined_call_operand.hbm [shape: bf16[128,128], index: 5, kind: input, shape index: {}]   ;;  %s745_s6 = inlined_call_operand.vmem [shape: f32[1,128], index: 6, kind: input, shape index: {}]   ;;  %s746_s7 = inlined_call_operand.hbm [shape: f32[8,128], index: 7, kind: output, shape index: {}]  }
   0x1   :  { %13 = vsyncpa [#allocation6], 0 }
   0x2   :  { %14 = vsyncpa [#allocation9], 0 }
   0x3   :  { %15 = vsyncpa [#allocation4], 0  ;;  %s633_s24 = smov [#allocation5]  }
   0x4   :  { %s31_s25 = sshll.u32 %s633_s24, 4  ;;  %s32_s25 = int_to_ptr.vmem [resolvable:$true] %s31_s25 }
   0x5   :  { %s533_s26 = scalar_lea.vmem %s32_s25, 256  ;;  %p538_p1 = scmp.lt.s32.totalorder %s32_s25, %s32_s25 }
   0x6   :  { %p534_p0 = scmp.ne.s32.totalorder %s32_s25, %s533_s26  ;;  %p539_p2 = scmp.lt.s32.totalorder %s533_s26, %s533_s26 }
   0x8   :  { %p540_p3 = por %p539_p2, %p538_p1 }
   0xa   :  { %p541_p4 = pnand %p540_p3, %p534_p0 }
   0xc   :  { %544 = shalt.err (!%p541_p4)
}
   0xd   :  { %s634_s27 = smov 64   ;;  %s635_s28 = smov 4  }
   0xe   :  { %37 = dma.hbm_to_vmem [thread:$0]  %s740_s1, 256, %s32_s25, [#allocation6], %s634_s27, %s634_s27, %s635_s28  }
   0xf   :  { %s636_s8 = smov [#allocation2]   ;;  %s637_s10 = smov [#allocation7]  }
  0x10   :  { %s22_s9 = sshll.u32 %s636_s8, 4  ;;  %s45_s11 = sshll.u32 %s637_s10, 4  ;;  %s23_s9 = int_to_ptr.vmem [resolvable:$true] %s22_s9  ;;  %s46_s11 = int_to_ptr.vmem [resolvable:$true] %s45_s11 }
  0x11   :  { %s553_s12 = scalar_lea.vmem %s23_s9, 128  ;;  %p558_p6 = scmp.lt.s32.totalorder %s23_s9, %s23_s9 }
  0x12   :  { %p554_p5 = scmp.ne.s32.totalorder %s23_s9, %s553_s12  ;;  %p559_p7 = scmp.lt.s32.totalorder %s553_s12, %s553_s12 }
  0x14   :  { %p560_p8 = por %p559_p7, %p558_p6 }
  0x16   :  { %p561_p9 = pnand %p560_p8, %p554_p5 }
  0x18   :  { %564 = shalt.err (!%p561_p9)
}
  0x19   :  { %25 = dma.hbm_to_vmem [thread:$0]  %s739_s0, 128, %s23_s9, [#allocation3]  }
  0x1a   :  { %s573_s15 = scalar_lea.vmem %s46_s11, 1024  ;;  %p578_p11 = scmp.lt.s32.totalorder %s46_s11, %s46_s11 }
  0x1b   :  { %p574_p10 = scmp.ne.s32.totalorder %s46_s11, %s573_s15  ;;  %p579_p12 = scmp.lt.s32.totalorder %s573_s15, %s573_s15 }
  0x1d   :  { %p580_p13 = por %p579_p12, %p578_p11 }
  0x1f   :  { %p581_p0 = pnand %p580_p13, %p574_p10 }
  0x21   :  { %584 = shalt.err (!%p581_p0)
}
  0x22   :  { %51 = dma.hbm_to_vmem [thread:$0]  %s742_s3, 1024, %s46_s11, [#allocation6], %s634_s27, %s634_s27, %s635_s28  }
  0x23   :  { %s638_s17 = smov [#allocation8]  }
  0x24   :  { %s59_s18 = sshll.u32 %s638_s17, 4  ;;  %s60_s18 = int_to_ptr.vmem [resolvable:$true] %s59_s18 }
  0x25   :  { %s593_s19 = scalar_lea.vmem %s60_s18, 1024  ;;  %p598_p2 = scmp.lt.s32.totalorder %s60_s18, %s60_s18 }
  0x26   :  { %p594_p1 = scmp.ne.s32.totalorder %s60_s18, %s593_s19  ;;  %p599_p3 = scmp.lt.s32.totalorder %s593_s19, %s593_s19 }
  0x28   :  { %p600_p4 = por %p599_p3, %p598_p2 }
  0x2a   :  { %p601_p5 = pnand %p600_p4, %p594_p1 }
  0x2c   :  { %604 = shalt.err (!%p601_p5)
}
  0x2d   :  { %65 = dma.hbm_to_vmem [thread:$0]  %s744_s5, 1024, %s60_s18, [#allocation9], %s634_s27, %s634_s27, %s635_s28  }
  0x2e   :  { %625 = dma.done.wait [#allocation3], 128  }
  0x2f   :  { %626 = vsyncadd [#allocation3], 4294967168 }
  0x30   :  { %627 = dma.done.wait [#allocation6], 1280  }
  0x31   :  { %628 = vsyncadd [#allocation6], 4294966016 }
  0x32   :  { %629 = dma.done.wait [#allocation9], 1024  }
  0x33   :  { %630 = vsyncadd [#allocation9], 4294966272  ;;  %v639_v0 = vmov 0.0   ;;  %vm640_vm0 = vmmov 0   ;;  %v503_v1 = vld [vmem:[#allocation5 + $0x8] sm:$0xff]   ;;  %v504_v2 = vld [vmem:[#allocation5] sm:$0xff]  }
  0x34   :  { %446 = vmatprep.subr.bf16.mxu0 %v639_v0  ;;  %450 = vmatprep.mubr.msk.bf16.mxu0 %vm640_vm0, %v639_v0  ;;  %v81_v3 = vld [vmem:[#allocation2] sm:$0xff]  ;;  %v505_v4 = vld [vmem:[#allocation7 + $0x38] sm:$0xff]   ;;  %v506_v6 = vld [vmem:[#allocation7 + $0x30] sm:$0xff]   ;;  %vm106_vm1 = vcmask 261120  }
  0x35   :  { %454 = vmatprep.subr.bf16.mxu1 %v639_v0  ;;  %470 = vmatprep.mubr.msk.bf16.mxu1 %vm640_vm0, %v639_v0  ;;  %v82_v5 = vpack.c.bf16 %v81_v3, %v81_v3  ;;  %v507_v7 = vld [vmem:[#allocation7 + $0x28] sm:$0xff]   ;;  %v508_v8 = vld [vmem:[#allocation7 + $0x20] sm:$0xff]   ;;  %v509_v9 = vld [vmem:[#allocation7 + $0x18] sm:$0xff]  }
  0x36   :  { %447 = vmatpush3.bf16.msra.mxu0 %v503_v1  ;;  %455 = vmatpush3.bf16.msra.mxu1 %v505_v4  ;;  %v510_v10 = vld [vmem:[#allocation7 + $0x10] sm:$0xff]   ;;  %v511_v11 = vld [vmem:[#allocation7 + $0x8] sm:$0xff]   ;;  %v512_v12 = vld [vmem:[#allocation7] sm:$0xff]  }
  0x37   :  { %448 = vmatprep.subr.bf16.mxu0 %v639_v0  ;;  %456 = vmatprep.subr.bf16.mxu1 %v639_v0  ;;  %v513_v13 = vld [vmem:[#allocation8 + $0x38] sm:$0xff]   ;;  %v514_v14 = vld [vmem:[#allocation8 + $0x30] sm:$0xff]   ;;  %v515_v15 = vld [vmem:[#allocation8 + $0x28] sm:$0xff]  }
  0x38   :  { %v516_v16 = vld [vmem:[#allocation8 + $0x20] sm:$0xff]   ;;  %v517_v17 = vld [vmem:[#allocation8 + $0x18] sm:$0xff]   ;;  %v518_v18 = vld [vmem:[#allocation8 + $0x10] sm:$0xff]  }
  0x39   :  { %v403_v19 = vld [vmem:[%s741_s2] ss:$0 sm:$0xff]  ;;  %v520_v28 = vld [vmem:[#allocation8] sm:$0xff]  }
  0x3a   :  { %449 = vmatpush3.bf16.msra.mxu0 %v504_v2  ;;  %457 = vmatpush3.bf16.msra.mxu1 %v506_v6  ;;  %v519_v27 = vld [vmem:[#allocation8 + $0x8] sm:$0xff]  }
  0x3b   :  { %474 = vmatprep.subr.bf16.mxu0 %v639_v0  ;;  %458 = vmatprep.subr.bf16.mxu1 %v639_v0  ;;  %v407_v29 = vld [vmem:[%s743_s4] ss:$0 sm:$0xff]  ;;  %s641_s4 = smov [#allocation10]  }
  0x3c   :  { %v416_v37 = vld [vmem:[%s745_s6] ss:$0 sm:$0xff]  ;;  %s392_s24 = sshll.u32 %s641_s4, 4  ;;  %s393_s24 = int_to_ptr.vmem [resolvable:$true] %s392_s24 }
  0x3d   :  { %451 = vmatmul.mubr.msk.bf16.vlgmr.msra.gmra.mxu0 %vm106_vm1, %v82_v5  ;;  %s605_s6 = scalar_lea.vmem %s393_s24, 128  ;;  %p610_p7 = scmp.lt.s32.totalorder %s393_s24, %s393_s24 }
  0x3e   :  { %490 = vmatprep.mubr.msk.bf16.mxu0 %vm640_vm0, %v639_v0  ;;  %459 = vmatpush3.bf16.msra.mxu1 %v507_v7  ;;  %p606_p6 = scmp.ne.s32.totalorder %s393_s24, %s605_s6  ;;  %p611_p8 = scmp.lt.s32.totalorder %s605_s6, %s605_s6 }
  0x3f   :  { %460 = vmatprep.subr.bf16.mxu1 %v639_v0  ;;  %475 = vmatpush3.bf16.msra.mxu0 %v513_v13 }
  0x40   :  { %476 = vmatprep.subr.bf16.mxu0 %v639_v0  ;;  %p612_p9 = por %p611_p8, %p610_p7 }
  0x42   :  { %461 = vmatpush3.bf16.msra.mxu1 %v508_v8  ;;  %p613_p10 = pnand %p612_p9, %p606_p6 }
  0x43   :  { %462 = vmatprep.subr.bf16.mxu1 %v639_v0  ;;  %477 = vmatpush3.bf16.msra.mxu0 %v514_v14 }
  0x44   :  { %478 = vmatprep.subr.bf16.mxu0 %v639_v0 }
  0x46   :  { %463 = vmatpush3.bf16.msra.mxu1 %v509_v9 }
  0x47   :  { %464 = vmatprep.subr.bf16.mxu1 %v639_v0  ;;  %479 = vmatpush3.bf16.msra.mxu0 %v515_v15 }
  0x48   :  { %480 = vmatprep.subr.bf16.mxu0 %v639_v0 }
  0x4a   :  { %465 = vmatpush3.bf16.msra.mxu1 %v510_v10 }
  0x4b   :  { %466 = vmatprep.subr.bf16.mxu1 %v639_v0  ;;  %481 = vmatpush3.bf16.msra.mxu0 %v516_v16 }
  0x4c   :  { %482 = vmatprep.subr.bf16.mxu0 %v639_v0 }
  0x4e   :  { %467 = vmatpush3.bf16.msra.mxu1 %v511_v11 }
  0x4f   :  { %468 = vmatprep.subr.bf16.mxu1 %v639_v0  ;;  %483 = vmatpush3.bf16.msra.mxu0 %v517_v17 }
  0x50   :  { %484 = vmatprep.subr.bf16.mxu0 %v639_v0 }
  0x52   :  { %469 = vmatpush3.bf16.msra.mxu1 %v512_v12 }
  0x53   :  { %485 = vmatpush3.bf16.msra.mxu0 %v518_v18 }
  0x54   :  { %486 = vmatprep.subr.bf16.mxu0 %v639_v0 }
  0x57   :  { %487 = vmatpush3.bf16.msra.mxu0 %v519_v27 }
  0x58   :  { %488 = vmatprep.subr.bf16.mxu0 %v639_v0 }
  0x5b   :  { %489 = vmatpush3.bf16.msra.mxu0 %v520_v28 }
  0xfd   :  { %v144_v20 = vpop.f32.mrf.mxu0 }
  0xfe   :  { %v145_v21 = vadd.f32 %v403_v19, %v144_v20 }
  0xff   :  { %v452_v22 = vpop.f32.mrf.mxu0 }
 0x100   :  { %v150_v23 = vmax.f32 %v145_v21, 0.0 }
 0x101   :  { %v147_v24 = vpop.f32.mrf.mxu0 }
 0x102   :  { %v151_v25 = vpack.c.bf16 %v150_v23, %v150_v23 }
 0x103   :  { %v453_v26 = vpop.f32.mrf.mxu0 }
 0x104   :  { %471 = vmatmul.mubr.bf16.vlgmr.msra.gmra.mxu1 %v151_v25 }
 0x1c4   :  { %v257_v30 = vpop.f32.mrf.mxu1 }
 0x1c5   :  { %v258_v31 = vadd.f32 %v407_v29, %v257_v30 }
 0x1c6   :  { %v472_v32 = vpop.f32.mrf.mxu1 }
 0x1c7   :  { %v263_v33 = vmax.f32 %v258_v31, 0.0 }
 0x1c8   :  { %v260_v34 = vpop.f32.mrf.mxu1 }
 0x1c9   :  { %v264_v35 = vpack.c.bf16 %v263_v33, %v263_v33 }
 0x1ca   :  { %v473_v36 = vpop.f32.mrf.mxu1 }
 0x1cb   :  { %491 = vmatmul.mubr.bf16.vlgmr.msra.gmra.mxu0 %v264_v35 }
 0x28b   :  { %v370_v38 = vpop.f32.mrf.mxu0 }
 0x28c   :  { %v371_v39 = vadd.f32 %v416_v37, %v370_v38 }
 0x28d   :  { %v492_v40 = vpop.f32.mrf.mxu0 }
 0x28e   :  { %376 = vmax.xlane.f32.xlu0 %v371_v39 }
 0x28f   :  { %v373_v41 = vpop.f32.mrf.mxu0 }
 0x291   :  { %v493_v42 = vpop.f32.mrf.mxu0 }
 0x317   :  { %v377_v43 = vpop.xlane.xlu0 %376 }
 0x318   :  { %v378_v44 = vsub.f32 %v371_v39, %v377_v43 }
 0x31a   :  { %v379_v45 = vmul.f32 1.442695, %v378_v44 }
 0x31c   :  { %521 = vpow2.f32 %v379_v45 }
 0x329   :  { %v522_v46 = vpop.eup %521 }
 0x32a   :  { %381 = vadd.xlane.f32.xlu0 %v522_v46 }
 0x3b3   :  { %v382_v47 = vpop.xlane.xlu0 %381 }
 0x3b4   :  { %523 = vrcp.f32 %v382_v47 }
 0x3c1   :  { %v524_v48 = vpop.eup %523 }
 0x3c2   :  { %v384_v49 = vmul.f32 %v524_v48, %v522_v46 }
 0x3c4   :  { %385 = vst [vmem:[#allocation10] sm:$0xff] %v384_v49 }
 0x3c5   :  { %616 = shalt.err (!%p613_p10)
}
 0x3c6   :  { %395 = dma.vmem_to_hbm [thread:$0]  %s393_s24, 128, %s746_s7, [#allocation4]  }
 0x3c7   :  { %631 = dma.done.wait [#allocation4], 128  }
 0x3c8   :  { %632 = vsyncadd [#allocation4], 4294967168 }
 0x3c9   :  { %399 = vsyncpa [#allocation3], 1 }
 0x3ca   :  { %400 = vsyncpa [#allocation6], 1 }
 0x3cb   :  { %401 = vsyncpa [#allocation9], 1 }
 0x3cc   :  { %402 = vsyncpa [#allocation4], 1 }

</bundles_post_ra>
